<compile_context>
chip_gen: v6e
topology: v6e:2x2x1
jax: 0.10.0
libtpu: 0.0.40
codegen_flags: <defaults>
</compile_context>

<pallas_src>
import functools
import math

import jax
import jax.numpy as jnp
from jax.experimental import pallas as pl
from jax.experimental.pallas import tpu as pltpu

_LANE = 128
_SUBLANE = 8
_MAX_BLOCK_TOKENS = 2048


def _round_up(x, m):
    return (x + m - 1) // m * m


def _softplus(x):
    # Numerically stable softplus, identical to torch.nn.Softplus(beta=1).
    # exp/log1p go to the EUP slot.
    return jnp.maximum(x, 0.0) + jnp.log1p(jnp.exp(-jnp.abs(x)))


def _vmem_capacity_bytes():
    try:
        info = pltpu.get_tpu_info()
        cap = getattr(info, "vmem_capacity_bytes", None)
        if cap:
            return int(cap)
    except Exception:
        pass
    return 64 * 1024 * 1024  # conservative fallback (v7x per-core VMEM)


def _kuma_gate_kernel(h_ref, w_ref, bias_ref, out_ref, *, o_sub):
    h = h_ref[...]                                                   # [TM, H]
    z = jnp.dot(h, w_ref[...], preferred_element_type=jnp.float32)  # [TM, Opad]
    z = z + bias_ref[...]                                            # [1, Opad] bcast
    zt = z.T                                                         # [Opad, TM] (XLU)
    out_ref[...] = _softplus(zt[:o_sub, :]).astype(out_ref.dtype)   # [o_sub, TM]


@functools.partial(jax.jit, static_argnames=("max_block_tokens",))
def kuma_gate_params(hidden, wa, ba, wb, bb, *, max_block_tokens=_MAX_BLOCK_TOKENS):
    """Fused KumaGate forward (a/b parameter computation).

    hidden: [..., insize] float32
    wa, wb: [outsize, insize] float32   (PyTorch nn.Linear weight layout)
    ba, bb: [outsize]         float32
    returns (a, b), each [..., outsize]:
        a = softplus(hidden @ wa.T + ba), b = softplus(hidden @ wb.T + bb)
    """
    lead_shape = hidden.shape[:-1]
    insize = hidden.shape[-1]
    outsize = wa.shape[0]
    o2 = 2 * outsize                       # a-cols followed by b-cols
    o_pad = _round_up(o2, _LANE)           # lane-dense matmul N dim
    o_sub = _round_up(o2, _SUBLANE)        # sublane rows of the transposed output

    n = math.prod(lead_shape) if lead_shape else 1
    h2 = hidden.reshape(n, insize).astype(jnp.float32)

    # Fused a/b RHS: [insize, o_pad] with the a-net in cols [0:outsize] and the
    # b-net in cols [outsize:2*outsize]; one matching bias row.
    w_cat = jnp.concatenate([wa, wb], axis=0).T.astype(jnp.float32)   # [H, 2*O]
    w_cat = jnp.pad(w_cat, ((0, 0), (0, o_pad - o2)))
    b_cat = jnp.concatenate([ba, bb], axis=0).astype(jnp.float32).reshape(1, o2)
    b_cat = jnp.pad(b_cat, ((0, 0), (0, o_pad - o2)))

    # Generation-aware VMEM budget and token-tile size.
    capacity = _vmem_capacity_bytes()
    vmem_limit = capacity // 2             # ~32 MiB on v7x, ~64 MiB on v5e/v6e
    budget = (3 * vmem_limit) // 4         # leave pipelining / scratch headroom
    # Per-token bytes: double-buffered hidden tile + z/zt temporaries
    # + double-buffered transposed output tile.
    per_token = 4 * (2 * insize + 2 * o_pad + 2 * o_sub)
    # Fixed bytes: weight + bias blocks (default double-buffered) + slack.
    fixed = 4 * (2 * insize * o_pad + 2 * _SUBLANE * o_pad) + (1 << 20)
    tm = (budget - fixed) // per_token
    tm = max(_LANE, min(int(tm), max_block_tokens))
    tm = (tm // _LANE) * _LANE
    # Keep >=2 token tiles when possible so v7x's two TensorCores both get work.
    tm = max(_LANE, min(tm, _round_up(-(-n // 2), _LANE)))

    # Never request more scoped VMEM than physically sensible, but cover the
    # actual estimate for pathologically large insize.
    est = fixed + tm * per_token
    vmem_limit = int(min(max(vmem_limit, est + (4 << 20)), capacity - (8 << 20)))

    n_pad = _round_up(n, tm)
    if n_pad != n:
        h2 = jnp.pad(h2, ((0, n_pad - n), (0, 0)))

    grid = (n_pad // tm,)

    hidden_spec = pl.BlockSpec((tm, insize), lambda i: (i, 0))
    # Constant index_map -> weights/bias stay resident in VMEM across the grid.
    w_spec = pl.BlockSpec((insize, o_pad), lambda i: (0, 0))
    bias_spec = pl.BlockSpec((1, o_pad), lambda i: (0, 0))
    # Transposed, sublane-major output: lane-dense (tm multiple of 128) stores.
    out_spec = pl.BlockSpec((o_sub, tm), lambda i: (0, i))

    out_t = pl.pallas_call(
        functools.partial(_kuma_gate_kernel, o_sub=o_sub),
        out_shape=jax.ShapeDtypeStruct((o_sub, n_pad), jnp.float32),
        grid_spec=pltpu.PrefetchScalarGridSpec(
            num_scalar_prefetch=0,
            grid=grid,
            in_specs=[hidden_spec, w_spec, bias_spec],
            out_specs=out_spec,
        ),
        compiler_params=pltpu.CompilerParams(
            dimension_semantics=("parallel",),
            vmem_limit_bytes=vmem_limit,
        ),
    )(h2, w_cat, b_cat)

    ab = out_t[:o2, :n]                                    # [2*outsize, N]
    a = ab[:outsize, :].T.reshape(lead_shape + (outsize,))
    b = ab[outsize:, :].T.reshape(lead_shape + (outsize,))
    return a, b


if __name__ == "__main__":
    # Small shapes consistent with the module: hidden [batch, seq, insize],
    # outsize defaults to 1.
    B, S, H, O = 2, 8, 32, 1

    key = jax.random.PRNGKey(0)
    kh, kwa, kba, kwb, kbb = jax.random.split(key, 5)

    hidden = jax.random.normal(kh, (B, S, H), dtype=jnp.float32)
    wa = jax.random.normal(kwa, (O, H), dtype=jnp.float32) * 0.1
    ba = jax.random.normal(kba, (O,), dtype=jnp.float32) * 0.1
    wb = jax.random.normal(kwb, (O, H), dtype=jnp.float32) * 0.1
    bb = jax.random.normal(kbb, (O,), dtype=jnp.float32) * 0.1

    a, b = kuma_gate_params(hidden, wa, ba, wb, bb)
    a = jax.block_until_ready(a)
    b = jax.block_until_ready(b)

    # Pure-JAX reference of the PyTorch forward's tensor compute.
    ref_a = jax.nn.softplus(hidden @ wa.T + ba)
    ref_b = jax.nn.softplus(hidden @ wb.T + bb)

    assert a.shape == (B, S, O) and b.shape == (B, S, O)
    ok = (bool(jnp.allclose(a, ref_a, atol=1e-5, rtol=1e-5))
          and bool(jnp.allclose(b, ref_b, atol=1e-5, rtol=1e-5)))

    if ok:
        print("KERNEL_OK")
</pallas_src>

<mosaic_0001>
module attributes {stable_mosaic.version = 11 : i64} {
  func.func @_kuma_gate_kernel(%arg0: i32, %arg1: memref<128x32xf32, #tpu.memory_space<vmem>>, %arg2: memref<32x128xf32, #tpu.memory_space<vmem>>, %arg3: memref<1x128xf32, #tpu.memory_space<vmem>>, %arg4: memref<8x128xf32, #tpu.memory_space<vmem>>) attributes {dimension_semantics = [#tpu.dimension_semantics<parallel>], iteration_bounds = array<i64: 1>, scalar_prefetch = 0 : i64, scratch_operands = 0 : i64, tpu.core_type = #tpu.core_type<tc>, window_params = [{transform_indices = @transform_0, window_bounds = array<i64: 128, 32>}, {pipeline_mode = #tpu.pipeline_mode<synchronous>, transform_indices = @transform_1, window_bounds = array<i64: 32, 128>}, {pipeline_mode = #tpu.pipeline_mode<synchronous>, transform_indices = @transform_2, window_bounds = array<i64: 1, 128>}, {transform_indices = @transform_3, window_bounds = array<i64: 8, 128>}]} {
    %c0 = arith.constant 0 : index
    %c0_0 = arith.constant 0 : index
    %0 = vector.load %arg1[%c0, %c0_0] : memref<128x32xf32, #tpu.memory_space<vmem>>, vector<128x32xf32>
    %c0_1 = arith.constant 0 : index
    %c0_2 = arith.constant 0 : index
    %1 = vector.load %arg2[%c0_1, %c0_2] : memref<32x128xf32, #tpu.memory_space<vmem>>, vector<32x128xf32>
    %cst = arith.constant dense<0.000000e+00> : vector<128x128xf32>
    %2 = tpu.matmul %0, %1, %cst {dimension_numbers = #tpu.dot_dimension_numbers<[1], [0], [0], [1], [0, 0, 1, 1], [], []>} : vector<128x32xf32>, vector<32x128xf32>, vector<128x128xf32> -> vector<128x128xf32>
    %c0_3 = arith.constant 0 : index
    %c0_4 = arith.constant 0 : index
    %3 = vector.load %arg3[%c0_3, %c0_4] : memref<1x128xf32, #tpu.memory_space<vmem>>, vector<1x128xf32>
    %4 = vector.broadcast %3 : vector<1x128xf32> to vector<128x128xf32>
    %5 = arith.addf %2, %4 : vector<128x128xf32>
    %6 = tpu.transpose %5, [1, 0] : vector<128x128xf32> -> vector<128x128xf32>
    %7 = vector.extract_strided_slice %6 {offsets = [0, 0], sizes = [8, 128], strides = [1, 1]} : vector<128x128xf32> to vector<8x128xf32>
    %cst_5 = arith.constant 0.000000e+00 : f32
    %8 = vector.broadcast %cst_5 : f32 to vector<8x128xf32>
    %9 = arith.maximumf %7, %8 : vector<8x128xf32>
    %10 = math.absf %7 : vector<8x128xf32>
    %cst_6 = arith.constant 0.000000e+00 : f32
    %11 = vector.broadcast %cst_6 : f32 to vector<8x128xf32>
    %12 = arith.subf %11, %10 : vector<8x128xf32>
    %13 = math.exp %12 : vector<8x128xf32>
    %14 = math.log1p %13 : vector<8x128xf32>
    %15 = arith.addf %9, %14 : vector<8x128xf32>
    %c0_7 = arith.constant 0 : index
    %c0_8 = arith.constant 0 : index
    %16 = vector.load %arg4[%c0_7, %c0_8] : memref<8x128xf32, #tpu.memory_space<vmem>>, vector<8x128xf32>
    tpu.vector_store %arg4[%c0_7, %c0_8], %15 {strides = array<i32>} : memref<8x128xf32, #tpu.memory_space<vmem>>, vector<8x128xf32>,
    return
  }
  func.func @transform_0(%arg0: i32) -> (i32, i32) {
    %c0_i32 = arith.constant 0 : i32
    %c0_i32_0 = arith.constant 0 : i32
    return %arg0, %c0_i32 : i32, i32
  }
  func.func @transform_1(%arg0: i32) -> (i32, i32) {
    %c0_i32 = arith.constant 0 : i32
    %c0_i32_0 = arith.constant 0 : i32
    %c0_i32_1 = arith.constant 0 : i32
    return %c0_i32, %c0_i32_0 : i32, i32
  }
  func.func @transform_2(%arg0: i32) -> (i32, i32) {
    %c0_i32 = arith.constant 0 : i32
    %c0_i32_0 = arith.constant 0 : i32
    %c0_i32_1 = arith.constant 0 : i32
    return %c0_i32, %c0_i32_0 : i32, i32
  }
  func.func @transform_3(%arg0: i32) -> (i32, i32) {
    %c0_i32 = arith.constant 0 : i32
    %c0_i32_0 = arith.constant 0 : i32
    return %c0_i32, %arg0 : i32, i32
  }
}

</mosaic_0001>

<bundles_post_ra>
// kernel: kuma_gate_params.1
= control target key start
LH: loop header
LB: loop body
LE: loop exit
PB: predicated region body
PF: predicated region fallthrough
CT: control target
= control target key end

     0   :  { %vm41_vm0 = vcmask 261120   ;;  %s470_s1 = inlined_call_operand.vmem [shape: f32[32,128], index: 1, kind: input, shape index: {}]   ;;  %s471_s0 = inlined_call_operand.vmem [shape: f32[128,32], index: 0, kind: input, shape index: {}]   ;;  %s472_s2 = inlined_call_operand.vmem [shape: f32[1,128], index: 2, kind: input, shape index: {}]   ;;  %s473_s3 = inlined_call_operand.vmem [shape: f32[8,128], index: 3, kind: output, shape index: {}]  }
   0x1   :  { %v33_v0 = vld [vmem:[%s470_s1 + $0x18] sm:$0xff]  ;;  %v32_v1 = vld [vmem:[%s470_s1 + $0x10] sm:$0xff]  ;;  %v14_v2 = vld [vmem:[%s471_s0] sm:$0xff] }
   0x2   :  { %324 = vmatprep.subr.mxu0 %v33_v0  ;;  %356 = vmatprep.subr.mxu1 %v33_v0  ;;  %v31_v3 = vld [vmem:[%s470_s1 + $0x8] sm:$0xff]  ;;  %v30_v4 = vld [vmem:[%s470_s1] sm:$0xff]  ;;  %v16_v6 = vld [vmem:[%s471_s0 + $0x10] sm:$0xff] }
   0x3   :  { %325 = vmatpush3.msra.mxu0 %v33_v0  ;;  %332 = vmatprep.mubr.msk.f32.mxu0 %vm41_vm0, %v14_v2  ;;  %v15_v5 = vld [vmem:[%s471_s0 + $0x8] sm:$0xff]  ;;  %v22_v7 = vld [vmem:[%s471_s0 + $0x40] sm:$0xff]  ;;  %v24_v9 = vld [vmem:[%s471_s0 + $0x50] sm:$0xff] }
   0x4   :  { %326 = vmatprep.subr.mxu0 %v32_v1  ;;  %360 = vmatpush3.msra.mxu1 %v33_v0  ;;  %v23_v8 = vld [vmem:[%s471_s0 + $0x48] sm:$0xff]  ;;  %v17_v10 = vld [vmem:[%s471_s0 + $0x18] sm:$0xff]  ;;  %v18_v11 = vld [vmem:[%s471_s0 + $0x20] sm:$0xff] }
   0x5   :  { %327 = vmatpush3.msra.mxu0 %v32_v1  ;;  %357 = vmatprep.subr.mxu1 %v32_v1  ;;  %v25_v12 = vld [vmem:[%s471_s0 + $0x58] sm:$0xff]  ;;  %v26_v13 = vld [vmem:[%s471_s0 + $0x60] sm:$0xff]  ;;  %v19_v14 = vld [vmem:[%s471_s0 + $0x28] sm:$0xff] }
   0x6   :  { %328 = vmatprep.subr.mxu0 %v31_v3  ;;  %361 = vmatpush3.msra.mxu1 %v32_v1  ;;  %v20_v15 = vld [vmem:[%s471_s0 + $0x30] sm:$0xff]  ;;  %v27_v16 = vld [vmem:[%s471_s0 + $0x68] sm:$0xff]  ;;  %v21_v18 = vld [vmem:[%s471_s0 + $0x38] sm:$0xff] }
   0x7   :  { %329 = vmatpush3.msra.mxu0 %v31_v3  ;;  %358 = vmatprep.subr.mxu1 %v31_v3  ;;  %v28_v17 = vld [vmem:[%s471_s0 + $0x70] sm:$0xff]  ;;  %v29_v19 = vld [vmem:[%s471_s0 + $0x78] sm:$0xff]  ;;  %v287_v21 = vld [vmem:[%s472_s2] ss:$0 sm:$0xff] }
   0x8   :  { %330 = vmatprep.subr.mxu0 %v30_v4  ;;  %362 = vmatpush3.msra.mxu1 %v31_v3 }
   0x9   :  { %331 = vmatpush3.msra.mxu0 %v30_v4  ;;  %359 = vmatprep.subr.mxu1 %v30_v4 }
   0xa   :  { %333 = vmatmul.mubr.msk.f32.vlgmr.msra.gmra.mxu0 %vm41_vm0, %v15_v5  ;;  %363 = vmatpush3.msra.mxu1 %v30_v4 }
   0xb   :  { %335 = vmatprep.mubr.msk.f32.mxu0 %vm41_vm0, %v16_v6  ;;  %344 = vmatprep.mubr.msk.f32.mxu1 %vm41_vm0, %v22_v7 }
   0xc   :  { %345 = vmatmul.mubr.msk.f32.vlgmr.msra.gmra.mxu1 %vm41_vm0, %v23_v8 }
   0xd   :  { %347 = vmatprep.mubr.msk.f32.mxu1 %vm41_vm0, %v24_v9 }
   0xe   :  { %336 = vmatmul.mubr.msk.f32.gmra.mxu0 %vm41_vm0, %v17_v10 }
   0xf   :  { %338 = vmatprep.mubr.msk.f32.mxu0 %vm41_vm0, %v18_v11 }
  0x10   :  { %348 = vmatmul.mubr.msk.f32.gmra.mxu1 %vm41_vm0, %v25_v12 }
  0x11   :  { %350 = vmatprep.mubr.msk.f32.mxu1 %vm41_vm0, %v26_v13 }
  0x12   :  { %339 = vmatmul.mubr.msk.f32.gmra.mxu0 %vm41_vm0, %v19_v14 }
  0x13   :  { %341 = vmatprep.mubr.msk.f32.mxu0 %vm41_vm0, %v20_v15 }
  0x14   :  { %351 = vmatmul.mubr.msk.f32.gmra.mxu1 %vm41_vm0, %v27_v16 }
  0x15   :  { %353 = vmatprep.mubr.msk.f32.mxu1 %vm41_vm0, %v28_v17 }
  0x16   :  { %342 = vmatmul.mubr.msk.f32.gmra.mxu0 %vm41_vm0, %v21_v18 }
  0x18   :  { %354 = vmatmul.mubr.msk.f32.gmra.mxu1 %vm41_vm0, %v29_v19 }
  0xca   :  { %v334_v20 = vpop.f32.mrf.mxu0 }
  0xcb   :  { %v162_v25 = vadd.f32 %v334_v20, %v287_v21 }
  0xcc   :  { %v156_v22 = vpop.f32.mrf.mxu0  ;;  %v346_v36 = vpop.f32.mrf.mxu1 }
  0xcd   :  { %v157_v23 = vadd.f32 %v287_v21, %v156_v22  ;;  %v202_v41 = vadd.f32 %v346_v36, %v287_v21 }
  0xce   :  { %v337_v24 = vpop.f32.mrf.mxu0  ;;  %v196_v38 = vpop.f32.mrf.mxu1 }
  0xcf   :  { %235 = vxpose.xlu0.b32.start [1/16] (narrow) %v157_v23, 8  ;;  %v172_v29 = vadd.f32 %v337_v24, %v287_v21  ;;  %v197_v39 = vadd.f32 %v287_v21, %v196_v38 }
  0xd0   :  { %v166_v26 = vpop.f32.mrf.mxu0  ;;  %v349_v40 = vpop.f32.mrf.mxu1 }
  0xd1   :  { %v167_v27 = vadd.f32 %v287_v21, %v166_v26  ;;  %v212_v45 = vadd.f32 %v349_v40, %v287_v21 }
  0xd2   :  { %v340_v28 = vpop.f32.mrf.mxu0  ;;  %v206_v42 = vpop.f32.mrf.mxu1 }
  0xd3   :  { %236 = vxpose.xlu0.b32.cont [2/16] (narrow) %v162_v25, 8  ;;  %v182_v33 = vadd.f32 %v340_v28, %v287_v21  ;;  %v207_v43 = vadd.f32 %v287_v21, %v206_v42 }
  0xd4   :  { %v176_v30 = vpop.f32.mrf.mxu0  ;;  %v352_v44 = vpop.f32.mrf.mxu1 }
  0xd5   :  { %v177_v31 = vadd.f32 %v287_v21, %v176_v30  ;;  %v222_v49 = vadd.f32 %v352_v44, %v287_v21 }
  0xd6   :  { %v343_v32 = vpop.f32.mrf.mxu0  ;;  %v216_v46 = vpop.f32.mrf.mxu1 }
  0xd7   :  { %237 = vxpose.xlu0.b32.cont [3/16] (narrow) %v167_v27, 8  ;;  %v192_v37 = vadd.f32 %v343_v32, %v287_v21  ;;  %v217_v47 = vadd.f32 %v287_v21, %v216_v46 }
  0xd8   :  { %v186_v34 = vpop.f32.mrf.mxu0  ;;  %v355_v48 = vpop.f32.mrf.mxu1 }
  0xd9   :  { %v187_v35 = vadd.f32 %v287_v21, %v186_v34  ;;  %v232_v52 = vadd.f32 %v355_v48, %v287_v21 }
  0xda   :  { %v226_v50 = vpop.f32.mrf.mxu1 }
  0xdb   :  { %238 = vxpose.xlu0.b32.cont [4/16] (narrow) %v172_v29, 8  ;;  %v227_v51 = vadd.f32 %v287_v21, %v226_v50 }
  0xdf   :  { %239 = vxpose.xlu0.b32.cont [5/16] (narrow) %v177_v31, 8 }
  0xe3   :  { %240 = vxpose.xlu0.b32.cont [6/16] (narrow) %v182_v33, 8 }
  0xe7   :  { %241 = vxpose.xlu0.b32.cont [7/16] (narrow) %v187_v35, 8 }
  0xeb   :  { %242 = vxpose.xlu0.b32.cont [8/16] (narrow) %v192_v37, 8 }
  0xef   :  { %243 = vxpose.xlu0.b32.cont [9/16] (narrow) %v197_v39, 8 }
  0xf3   :  { %244 = vxpose.xlu0.b32.cont [10/16] (narrow) %v202_v41, 8 }
  0xf7   :  { %245 = vxpose.xlu0.b32.cont [11/16] (narrow) %v207_v43, 8 }
  0xfb   :  { %246 = vxpose.xlu0.b32.cont [12/16] (narrow) %v212_v45, 8 }
  0xff   :  { %247 = vxpose.xlu0.b32.cont [13/16] (narrow) %v217_v47, 8 }
 0x103   :  { %248 = vxpose.xlu0.b32.cont [14/16] (narrow) %v222_v49, 8 }
 0x107   :  { %249 = vxpose.xlu0.b32.cont [15/16] (narrow) %v227_v51, 8 }
 0x10b   :  { %250 = vxpose.xlu0.b32.end [16/16] (narrow) %v232_v52, 8 }
 0x14b   :  { %v251_v53 = vpop.trf.xlu0 }
 0x14c   :  { %v268_v54 = vand.u32 2147483647, %v251_v53  ;;  %v267_v1 = vmax.f32 %v251_v53, 0.0 }
 0x14e   :  { %v269_v55 = vsub.f32 0.0, %v268_v54 }
 0x150   :  { %v270_v56 = vmul.f32 1.442695, %v269_v55 }
 0x152   :  { %364 = vpow2.f32 %v270_v56 }
 0x15f   :  { %v365_v57 = vpop.eup %364 }
 0x160   :  { %v272_v58 = vadd.f32 1.0, %v365_v57  ;;  %v275_v59 = vmul.f32 -0.5, %v365_v57  ;;  %v278_v61 = vand.u32 2147483647, %v365_v57 }
 0x162   :  { %366 = vlog2.f32 %v272_v58  ;;  %v276_v60 = vadd.f32 1.0, %v275_v59  ;;  %vm279_vm1 = vcmp.lt.f32.partialorder %v278_v61, 0.0004427343 }
 0x164   :  { %v277_v0 = vmul.f32 %v365_v57, %v276_v60 }
 0x16f   :  { %v367_v62 = vpop.eup %366 }
 0x170   :  { %v274_v63 = vmul.f32 0.6931472, %v367_v62 }
 0x172   :  { %v280_v2 = vsel %vm279_vm1, %v277_v0, %v274_v63 }
 0x173   :  { %v281_v3 = vadd.f32 %v280_v2, %v267_v1 }
 0x175   :  { %282 = vst [vmem:[%s473_s3] sm:$0xff] %v281_v3 }

</bundles_post_ra>
